<compile_context>
chip_gen: v7x
topology: tpu7x:2x2x1
jax: 0.10.0
libtpu: 0.0.40
codegen_flags: <defaults>
</compile_context>

<pallas_src>
import functools
import math

import jax
import jax.numpy as jnp
from jax.experimental import pallas as pl
from jax.experimental.pallas import tpu as pltpu


def _fold_factor(seq_len, feat_dim):
    """Rows folded per slab row: R*feat_dim % 128 == 0 and R % seq_len == 0."""
    lane = 128 // math.gcd(feat_dim, 128)
    return (seq_len * lane) // math.gcd(seq_len, lane)


def _pick_tile_m(m, target=512):
    """Slab-row tile: multiple of 8 (f32 sublanes) or the full dim; >= 2 blocks
    whenever m allows so the 'parallel' axis can shard across TensorCores (v7x)."""
    if m < 16:
        return m                              # single full block (block == full dim is allowed)
    t = min(target, (m // 2) // 8 * 8)        # at least 2 blocks
    return max(8, t)


def _trend_kernel(z_ref, w1_ref, b1_ref, w2_ref, b2_ref, out_ref):
    # z is streamed as f32; cast to bf16 on the VPU (kernel is HBM-bound, cast is free).
    z = z_ref[...].astype(w1_ref.dtype)
    # Folded dense1 + ReLU (MXU, f32 accumulate; bias/ReLU on VPU).
    h = jnp.dot(z, w1_ref[...], preferred_element_type=jnp.float32)
    h = jnp.maximum(h + b1_ref[...], 0.0)
    # Folded dense2 with the poly weighting and the reduction over trend_poly baked
    # into its columns -> result is directly the lane-dense (tile_m, R*F) output slab.
    out = jnp.dot(h.astype(w2_ref.dtype), w2_ref[...],
                  preferred_element_type=jnp.float32)
    out_ref[...] = (out + b2_ref[...]).astype(out_ref.dtype)


def prepare_trend_params(w1, b1, w2, b2, seq_len, feat_dim, trend_poly,
                         compute_dtype=jnp.bfloat16):
    """One-time parameter prep (hoisted out of the forward path).

    w1: (z_dim, F*P)  dense1 weight stored transposed to (in, out)
    b1: (F*P,) or (1, F*P)
    w2: (F*P, F*P)    dense2 weight (in, out); output column c2 = f*P + p
    b2: (F*P,) or (1, F*P)
    Returns (w1_fold, b1_fold, w2_fold, b2_fold) for trend_layer_forward.
    """
    F, P, T = feat_dim, trend_poly, seq_len
    FP = F * P
    Z = w1.shape[0]
    assert w1.shape == (Z, FP) and w2.shape == (FP, FP)
    R = _fold_factor(T, F)

    w1 = w1.astype(jnp.float32)
    w2 = w2.astype(jnp.float32)
    b1 = b1.reshape(1, FP).astype(jnp.float32)
    b2 = b2.reshape(FP).astype(jnp.float32)

    # poly[t, p] = (t / T)^p   (matches torch: lin_space ** p, 0**0 == 1)
    lin = jnp.arange(T, dtype=jnp.float32) / float(T)
    poly = jnp.stack([lin ** float(p) for p in range(P)], axis=1)              # (T, P)

    # Effective dense2 per time step: poly weighting + reduction over p folded in.
    #   w2_eff[t, c1, f] = sum_p w2[c1, f*P + p] * poly[t, p]
    w2_eff = jnp.einsum('cfp,tp->tcf', w2.reshape(FP, F, P), poly)             # (T, FP, F)
    b2_eff = jnp.einsum('fp,tp->tf', b2.reshape(F, P), poly)                   # (T, F)

    # Block-diagonal fold over R consecutive rows (slot r has time index r % T).
    t_of_r = jnp.arange(R) % T
    eye_r = jnp.eye(R, dtype=jnp.float32)
    w1_fold = jnp.kron(eye_r, w1)                                              # (R*Z, R*FP)
    b1_fold = jnp.tile(b1, (1, R))                                             # (1, R*FP)
    w2_fold = jnp.einsum('rs,rcf->rcsf', eye_r, w2_eff[t_of_r]).reshape(R * FP, R * F)
    b2_fold = b2_eff[t_of_r].reshape(1, R * F)

    # TODO(synk): for large z_dim / feat_dim*trend_poly the folded block-diagonal
    # weights outgrow VMEM; add a grid axis over folded output columns (or fall back
    # to an unfolded row-layout kernel) instead of keeping them fully resident.
    return (w1_fold.astype(compute_dtype), b1_fold,
            w2_fold.astype(compute_dtype), b2_fold)


def trend_layer_forward(z, w1_fold, b1_fold, w2_fold, b2_fold, *,
                        seq_len, feat_dim, slab_tile_target=512,
                        out_dtype=jnp.float32):
    """z: (B, seq_len, z_dim) f32 -> trend values (B, seq_len, feat_dim)."""
    B, T, Z = z.shape
    assert T == seq_len
    F = feat_dim
    R = _fold_factor(T, F)
    k = R // T                          # batches folded per slab row

    if B % k:
        # TODO(synk): ragged batch pad costs one extra HBM copy of z.
        pad = k - B % k
        z = jnp.concatenate([z, jnp.zeros((pad, T, Z), z.dtype)], axis=0)
    Bp = z.shape[0]
    M = (Bp * T) // R                   # output slab rows

    # Free, metadata-only reshape: R consecutive rows folded into lanes.
    # No dtype cast here (z stays f32 in HBM; cast happens inside the kernel).
    z_fold = z.reshape(M, R * Z)

    tile_m = _pick_tile_m(M, slab_tile_target)
    grid = (pl.cdiv(M, tile_m),)

    # Residents use constant index maps (fetched once). At these sizes their
    # double-buffered footprint is ~1 MiB; single-buffering / column tiling only
    # becomes worthwhile when the folded weights grow (see TODO in prep).
    def resident(arr):
        return pl.BlockSpec(arr.shape, lambda i: (0, 0))

    # VMEM budget from actual buffer arithmetic (2x z tile + 2x out slab + residents).
    need = (2 * tile_m * R * Z * 4 + 2 * tile_m * R * F * 4
            + 2 * (w1_fold.size + w2_fold.size) * w1_fold.dtype.itemsize
            + 2 * (b1_fold.size + b2_fold.size) * 4)
    vmem_limit = int(min(max(2 * need, 8 * 1024 * 1024), 64 * 1024 * 1024))

    out_slab = pl.pallas_call(
        _trend_kernel,
        out_shape=jax.ShapeDtypeStruct((M, R * F), out_dtype),
        grid=grid,
        in_specs=[
            pl.BlockSpec((tile_m, R * Z), lambda i: (i, 0)),   # z: streamed per tile
            resident(w1_fold),                                 # folded dense1 weight
            resident(b1_fold),                                 # folded dense1 bias
            resident(w2_fold),                                 # folded dense2 (poly baked in)
            resident(b2_fold),                                 # folded dense2 bias (poly baked in)
        ],
        out_specs=pl.BlockSpec((tile_m, R * F), lambda i: (i, 0)),
        compiler_params=pltpu.CompilerParams(
            dimension_semantics=("parallel",),
            vmem_limit_bytes=vmem_limit,
        ),
    )(z_fold, w1_fold, b1_fold, w2_fold, b2_fold)

    out = out_slab.reshape(Bp, T, F)    # metadata-only reshape back to (B, T, F)
    if Bp != B:
        out = out[:B]
    return out


if __name__ == "__main__":
    def run_case(B, T, F, Z, P, key):
        FP = F * P
        k1, k2, k3, k4, k5 = jax.random.split(key, 5)
        z = jax.random.normal(k1, (B, T, Z), dtype=jnp.float32)
        # PyTorch nn.Linear weight is (out, in); we store the transpose (in, out)
        # so the reference computes x @ W + b.
        w1 = jax.random.normal(k2, (Z, FP), dtype=jnp.float32) * 0.1
        b1 = jax.random.normal(k3, (1, FP), dtype=jnp.float32) * 0.1
        w2 = jax.random.normal(k4, (FP, FP), dtype=jnp.float32) * 0.1
        b2 = jax.random.normal(k5, (1, FP), dtype=jnp.float32) * 0.1

        params = prepare_trend_params(w1, b1, w2, b2, T, F, P)   # hoisted, one-time
        fwd = jax.jit(functools.partial(trend_layer_forward, seq_len=T, feat_dim=F))
        out = jax.block_until_ready(fwd(z, *params))

        # Pure-JAX f32 reference (kernel uses bf16 matmul inputs, f32 accumulation
        # -> loose-ish tolerance).
        zf = z.reshape(B * T, Z)
        tp = (jnp.maximum(zf @ w1 + b1, 0.0) @ w2 + b2).reshape(B, T, F, P)
        lin = jnp.arange(T, dtype=jnp.float32) / float(T)
        poly_space = jnp.stack([lin ** float(p) for p in range(P)], axis=0)   # (P, T)
        ref = jnp.einsum('ntdp,pt->ntd', tp, poly_space)

        assert out.shape == (B, T, F), out.shape
        err = float(jnp.max(jnp.abs(out - ref)))
        assert jnp.allclose(out, ref, atol=2e-2, rtol=2e-2), err

    key = jax.random.PRNGKey(0)
    ka, kb = jax.random.split(key)
    # Small shapes consistent with the module: batch=4, seq_len=8, feat_dim=4,
    # z_dim=32, trend_poly=3.
    run_case(4, 8, 4, 32, 3, ka)
    # Larger batch exercises the tiled grid (multiple slab blocks, parallel axis).
    run_case(64, 8, 4, 32, 3, kb)

    print("KERNEL_OK")
</pallas_src>

<mosaic_0001>
module attributes {stable_mosaic.version = 11 : i64} {
  func.func @_trend_kernel(%arg0: i32, %arg1: memref<1x1024xf32, #tpu.memory_space<vmem>>, %arg2: memref<1024x384xbf16, #tpu.memory_space<vmem>>, %arg3: memref<1x384xf32, #tpu.memory_space<vmem>>, %arg4: memref<384x128xbf16, #tpu.memory_space<vmem>>, %arg5: memref<1x128xf32, #tpu.memory_space<vmem>>, %arg6: memref<1x128xf32, #tpu.memory_space<vmem>>) attributes {dimension_semantics = [#tpu.dimension_semantics<parallel>], iteration_bounds = array<i64: 1>, scalar_prefetch = 0 : i64, scratch_operands = 0 : i64, tpu.core_type = #tpu.core_type<tc>, window_params = [{transform_indices = @transform_0, window_bounds = array<i64: 1, 1024>}, {pipeline_mode = #tpu.pipeline_mode<synchronous>, transform_indices = @transform_1, window_bounds = array<i64: 1024, 384>}, {pipeline_mode = #tpu.pipeline_mode<synchronous>, transform_indices = @transform_2, window_bounds = array<i64: 1, 384>}, {pipeline_mode = #tpu.pipeline_mode<synchronous>, transform_indices = @transform_3, window_bounds = array<i64: 384, 128>}, {pipeline_mode = #tpu.pipeline_mode<synchronous>, transform_indices = @transform_4, window_bounds = array<i64: 1, 128>}, {transform_indices = @transform_5, window_bounds = array<i64: 1, 128>}]} {
    %c0 = arith.constant 0 : index
    %c0_0 = arith.constant 0 : index
    %0 = vector.load %arg1[%c0, %c0_0] : memref<1x1024xf32, #tpu.memory_space<vmem>>, vector<1x1024xf32>
    %1 = arith.truncf %0 : vector<1x1024xf32> to vector<1x1024xbf16>
    %c0_1 = arith.constant 0 : index
    %c0_2 = arith.constant 0 : index
    %2 = vector.load %arg2[%c0_1, %c0_2] : memref<1024x384xbf16, #tpu.memory_space<vmem>>, vector<1024x384xbf16>
    %cst = arith.constant dense<0.000000e+00> : vector<1x384xf32>
    %3 = tpu.matmul %1, %2, %cst {dimension_numbers = #tpu.dot_dimension_numbers<[1], [0], [0], [1], [0, 0, 1, 1], [], []>} : vector<1x1024xbf16>, vector<1024x384xbf16>, vector<1x384xf32> -> vector<1x384xf32>
    %c0_3 = arith.constant 0 : index
    %c0_4 = arith.constant 0 : index
    %4 = vector.load %arg3[%c0_3, %c0_4] : memref<1x384xf32, #tpu.memory_space<vmem>>, vector<1x384xf32>
    %5 = arith.addf %3, %4 : vector<1x384xf32>
    %cst_5 = arith.constant 0.000000e+00 : f32
    %6 = vector.broadcast %cst_5 : f32 to vector<1x384xf32>
    %7 = arith.maximumf %5, %6 : vector<1x384xf32>
    %8 = arith.truncf %7 : vector<1x384xf32> to vector<1x384xbf16>
    %c0_6 = arith.constant 0 : index
    %c0_7 = arith.constant 0 : index
    %9 = vector.load %arg4[%c0_6, %c0_7] : memref<384x128xbf16, #tpu.memory_space<vmem>>, vector<384x128xbf16>
    %cst_8 = arith.constant dense<0.000000e+00> : vector<1x128xf32>
    %10 = tpu.matmul %8, %9, %cst_8 {dimension_numbers = #tpu.dot_dimension_numbers<[1], [0], [0], [1], [0, 0, 1, 1], [], []>} : vector<1x384xbf16>, vector<384x128xbf16>, vector<1x128xf32> -> vector<1x128xf32>
    %c0_9 = arith.constant 0 : index
    %c0_10 = arith.constant 0 : index
    %11 = vector.load %arg5[%c0_9, %c0_10] : memref<1x128xf32, #tpu.memory_space<vmem>>, vector<1x128xf32>
    %12 = arith.addf %10, %11 : vector<1x128xf32>
    %c0_11 = arith.constant 0 : index
    %c0_12 = arith.constant 0 : index
    %13 = vector.load %arg6[%c0_11, %c0_12] : memref<1x128xf32, #tpu.memory_space<vmem>>, vector<1x128xf32>
    tpu.vector_store %arg6[%c0_11, %c0_12], %12 {strides = array<i32>} : memref<1x128xf32, #tpu.memory_space<vmem>>, vector<1x128xf32>,
    return
  }
  func.func @transform_0(%arg0: i32) -> (i32, i32) {
    %c0_i32 = arith.constant 0 : i32
    %c0_i32_0 = arith.constant 0 : i32
    return %arg0, %c0_i32 : i32, i32
  }
  func.func @transform_1(%arg0: i32) -> (i32, i32) {
    %c0_i32 = arith.constant 0 : i32
    %c0_i32_0 = arith.constant 0 : i32
    %c0_i32_1 = arith.constant 0 : i32
    return %c0_i32, %c0_i32_0 : i32, i32
  }
  func.func @transform_2(%arg0: i32) -> (i32, i32) {
    %c0_i32 = arith.constant 0 : i32
    %c0_i32_0 = arith.constant 0 : i32
    %c0_i32_1 = arith.constant 0 : i32
    return %c0_i32, %c0_i32_0 : i32, i32
  }
  func.func @transform_3(%arg0: i32) -> (i32, i32) {
    %c0_i32 = arith.constant 0 : i32
    %c0_i32_0 = arith.constant 0 : i32
    %c0_i32_1 = arith.constant 0 : i32
    return %c0_i32, %c0_i32_0 : i32, i32
  }
  func.func @transform_4(%arg0: i32) -> (i32, i32) {
    %c0_i32 = arith.constant 0 : i32
    %c0_i32_0 = arith.constant 0 : i32
    %c0_i32_1 = arith.constant 0 : i32
    return %c0_i32, %c0_i32_0 : i32, i32
  }
  func.func @transform_5(%arg0: i32) -> (i32, i32) {
    %c0_i32 = arith.constant 0 : i32
    %c0_i32_0 = arith.constant 0 : i32
    return %arg0, %c0_i32 : i32, i32
  }
}

</mosaic_0001>

<bundles_post_ra>
// kernel: trend_layer_forward.1
= control target key start
LH: loop header
LB: loop body
LE: loop exit
PB: predicated region body
PF: predicated region fallthrough
CT: control target
= control target key end

     0   :  { %10 = vsyncpa [#allocation3], 0  ;;  %s2837_s0 = inlined_call_operand.vmem [shape: f32[1,1024], index: 0, kind: input, shape index: {}]   ;;  %s2838_s1 = inlined_call_operand.hbm [shape: bf16[1024,384], index: 1, kind: input, shape index: {}]   ;;  %s2839_s2 = inlined_call_operand.vmem [shape: f32[1,384], index: 2, kind: input, shape index: {}]   ;;  %s2840_s3 = inlined_call_operand.hbm [shape: bf16[384,128], index: 3, kind: input, shape index: {}]   ;;  %s2841_s4 = inlined_call_operand.vmem [shape: f32[1,128], index: 4, kind: input, shape index: {}]   ;;  %s2842_s5 = inlined_call_operand.vmem [shape: f32[1,128], index: 5, kind: output, shape index: {}]  }
   0x1   :  { %11 = vsyncpa [#allocation5], 0  ;;  %s2711_s18 = smov [#allocation2]   ;;  %s2663_s22 = scalar_lea.hbm %s2838_s1, 24576 }
   0x2   :  { %s19_s19 = sshll.u32 %s2711_s18, 4  ;;  %p2664_p0 = scmp.ne.s32.totalorder %s2838_s1, %s2663_s22  ;;  %s20_s19 = int_to_ptr.vmem [resolvable:$true] %s19_s19 }
   0x3   :  { %p2667_p1 = scmp.lt.u32.totalorder %s2663_s22, %s2838_s1 }
   0x5   :  { %p2669_p2 = pnand %p2667_p1, %p2664_p0 }
   0x7   :  { %2672 = shalt.err (!%p2669_p2)
}
   0x8   :  { %s2673_s27 = scalar_lea.vmem %s20_s19, 24576  ;;  %p2678_p4 = scmp.lt.s32.totalorder %s20_s19, %s20_s19 }
   0x9   :  { %p2674_p3 = scmp.ne.s32.totalorder %s20_s19, %s2673_s27  ;;  %p2679_p5 = scmp.lt.s32.totalorder %s2673_s27, %s2673_s27 }
   0xb   :  { %p2680_p6 = por %p2679_p5, %p2678_p4 }
   0xd   :  { %p2681_p7 = pnand %p2680_p6, %p2674_p3 }
   0xf   :  { %2684 = shalt.err (!%p2681_p7)
}
  0x10   :  { %s2712_s28 = smov 192   ;;  %s2713_s29 = smov 12  }
  0x11   :  { %25 = dma.hbm_to_vmem [thread:$0]  %s2838_s1, 24576, %s20_s19, [#allocation3], %s2712_s28, %s2712_s28, %s2713_s29  }
  0x12   :  { %s2714_s7 = smov [#allocation4]   ;;  %s2685_s11 = scalar_lea.hbm %s2840_s3, 3072 }
  0x13   :  { %s33_s8 = sshll.u32 %s2714_s7, 4  ;;  %p2686_p8 = scmp.ne.s32.totalorder %s2840_s3, %s2685_s11  ;;  %s34_s8 = int_to_ptr.vmem [resolvable:$true] %s33_s8 }
  0x14   :  { %p2689_p9 = scmp.lt.u32.totalorder %s2685_s11, %s2840_s3 }
  0x16   :  { %p2691_p10 = pnand %p2689_p9, %p2686_p8 }
  0x18   :  { %2694 = shalt.err (!%p2691_p10)
}
  0x19   :  { %s2695_s16 = scalar_lea.vmem %s34_s8, 3072  ;;  %p2700_p12 = scmp.lt.s32.totalorder %s34_s8, %s34_s8 }
  0x1a   :  { %p2696_p11 = scmp.ne.s32.totalorder %s34_s8, %s2695_s16  ;;  %p2701_p13 = scmp.lt.s32.totalorder %s2695_s16, %s2695_s16 }
  0x1c   :  { %p2702_p0 = por %p2701_p13, %p2700_p12 }
  0x1e   :  { %p2703_p1 = pnand %p2702_p0, %p2696_p11 }
  0x20   :  { %2706 = shalt.err (!%p2703_p1)
}
  0x21   :  { %s2715_s1 = smov 64   ;;  %s2716_s17 = smov 4  }
  0x22   :  { %39 = dma.hbm_to_vmem [thread:$0]  %s2840_s3, 3072, %s34_s8, [#allocation5], %s2715_s1, %s2715_s1, %s2716_s17  }
  0x23   :  { %2707 = dma.done.wait [#allocation3], 24576  }
  0x24   :  { %2708 = vsyncadd [#allocation3], 4294942720 }
  0x25   :  { %2709 = dma.done.wait [#allocation5], 3072  }
  0x26   :  { %2710 = vsyncadd [#allocation5], 4294964224  ;;  %v2383_v0 = vld [vmem:[#allocation2 + $0x4] ss:$12 sps:$4 sm:$0xff]   ;;  %v2385_v1 = vld [vmem:[#allocation2] ss:$12 sps:$4 sm:$0xff]   ;;  %v51_v7 = vlaneseq }
  0x27   :  { %1396 = vmatprep.subr.bf16.mxu0 %v2383_v0  ;;  %v2386_v2 = vld [vmem:[#allocation2 + $0x1c] ss:$12 sps:$4 sm:$0xff]   ;;  %v2388_v3 = vld [vmem:[#allocation2 + $0x18] ss:$12 sps:$4 sm:$0xff]   ;;  %v2389_v4 = vld [vmem:[#allocation2 + $0x34] ss:$12 sps:$4 sm:$0xff]  }
  0x28   :  { %1397 = vmatpush1.bf16.msra.mxu0 %v2385_v1  ;;  %v2391_v5 = vld [vmem:[#allocation2 + $0x30] ss:$12 sps:$4 sm:$0xff]   ;;  %v2392_v6 = vld [vmem:[#allocation2 + $0x4c] ss:$12 sps:$4 sm:$0xff]   ;;  %v2394_v8 = vld [vmem:[#allocation2 + $0x48] ss:$12 sps:$4 sm:$0xff]  }
  0x29   :  { %1398 = vmatprep.subr.bf16.mxu0 %v2386_v2  ;;  %v2395_v9 = vld [vmem:[#allocation2 + $0x64] ss:$12 sps:$4 sm:$0xff]   ;;  %v2773_v10 = vshrl.u32 %v51_v7, 7  ;;  %v2397_v11 = vld [vmem:[#allocation2 + $0x60] ss:$12 sps:$4 sm:$0xff]   ;;  %vm2718_vm0 = vmmov 0  }
  0x2a   :  { %v2398_v12 = vld [vmem:[#allocation2 + $0x7c] ss:$12 sps:$4 sm:$0xff]   ;;  %v2400_v14 = vld [vmem:[#allocation2 + $0x78] ss:$12 sps:$4 sm:$0xff]   ;;  %v2401_v15 = vld [vmem:[#allocation2 + $0x94] ss:$12 sps:$4 sm:$0xff]  }
  0x2b   :  { %v57_v13 = vsub.s32 1, %v2773_v10  ;;  %v2779_v16 = vld [vmem:[%s2837_s0] sm:$0xff]  ;;  %v2403_v18 = vld [vmem:[#allocation2 + $0x90] ss:$12 sps:$4 sm:$0xff]   ;;  %v2404_v19 = vld [vmem:[#allocation2 + $0xac] ss:$12 sps:$4 sm:$0xff]  }
  0x2c   :  { %1399 = vmatpush1.bf16.msra.mxu0 %v2388_v3  ;;  %v2437_v21 = vld [vmem:[#allocation2 + $0xc8] ss:$12 sps:$4 sm:$0xff]   ;;  %v2407_v24 = vld [vmem:[#allocation2 + $0xc4] ss:$12 sps:$4 sm:$0xff]   ;;  %v2442_v25 = vld [vmem:[#allocation2 + $0xe0] ss:$12 sps:$4 sm:$0xff]  }
  0x2d   :  { %1400 = vmatprep.subr.bf16.mxu0 %v2389_v4  ;;  %v58_v17 = vrot.slane %v2779_v16, %v57_v13  ;;  %v2438_v22 = vld [vmem:[#allocation2 + $0x8] ss:$12 sps:$4 sm:$0xff]   ;;  %2222 = vmatprep.subr.bf16.mxu1 %v2437_v21  ;;  %v2443_v26 = vld [vmem:[#allocation2 + $0x20] ss:$12 sps:$4 sm:$0xff]   ;;  %v2447_v29 = vld [vmem:[#allocation2 + $0xf8] ss:$12 sps:$4 sm:$0xff]  }
  0x2e   :  { %v2406_v23 = vld [vmem:[#allocation2 + $0xa8] ss:$12 sps:$4 sm:$0xff]   ;;  %2223 = vmatpush3.bf16.msra.mxu1 %v2438_v22  ;;  %v2409_v27 = vld [vmem:[#allocation2 + $0xc0] ss:$12 sps:$4 sm:$0xff]   ;;  %v2448_v30 = vld [vmem:[#allocation2 + $0x38] ss:$12 sps:$4 sm:$0xff]  }
  0x2f   :  { %v92_v20 = vpack.c.bf16 %v58_v17, %v58_v17  ;;  %v2410_v28 = vld [vmem:[#allocation2 + $0xdc] ss:$12 sps:$4 sm:$0xff]   ;;  %2224 = vmatprep.subr.bf16.mxu1 %v2442_v25  ;;  %v2412_v31 = vld [vmem:[#allocation2 + $0xd8] ss:$12 sps:$4 sm:$0xff]   ;;  %v2413_v32 = vld [vmem:[#allocation2 + $0xf4] ss:$12 sps:$4 sm:$0xff]  }
  0x30   :  { %1401 = vmatpush1.bf16.msra.mxu0 %v2391_v5  ;;  %v2452_v33 = vld [vmem:[#allocation2 + $0x110] ss:$12 sps:$4 sm:$0xff]   ;;  %v2457_v35 = vld [vmem:[#allocation2 + $0x128] ss:$12 sps:$4 sm:$0xff]   ;;  %v2416_v37 = vld [vmem:[#allocation2 + $0x10c] ss:$12 sps:$4 sm:$0xff]  }
  0x31   :  { %1402 = vmatprep.subr.bf16.mxu0 %v2392_v6  ;;  %1428 = vmatprep.mubr.bf16.mxu0 %v92_v20  ;;  %v2453_v34 = vld [vmem:[#allocation2 + $0x50] ss:$12 sps:$4 sm:$0xff]   ;;  %v2458_v38 = vld [vmem:[#allocation2 + $0x68] ss:$12 sps:$4 sm:$0xff]   ;;  %v2462_v39 = vld [vmem:[#allocation2 + $0x140] ss:$12 sps:$4 sm:$0xff]  }
  0x32   :  { %1592 = vmatprep.mubr.bf16.mxu1 %v92_v20  ;;  %2225 = vmatpush3.bf16.msra.mxu1 %v2443_v26  ;;  %v2415_v36 = vld [vmem:[#allocation2 + $0xf0] ss:$12 sps:$4 sm:$0xff]   ;;  %v2418_v40 = vld [vmem:[#allocation2 + $0x108] ss:$12 sps:$4 sm:$0xff]   ;;  %v2463_v42 = vld [vmem:[#allocation2 + $0x80] ss:$12 sps:$4 sm:$0xff]  }
  0x33   :  { %2226 = vmatprep.subr.bf16.mxu1 %v2447_v29  ;;  %v2419_v41 = vld [vmem:[#allocation2 + $0x124] ss:$12 sps:$4 sm:$0xff]   ;;  %v2421_v44 = vld [vmem:[#allocation2 + $0x120] ss:$12 sps:$4 sm:$0xff]   ;;  %v2422_v45 = vld [vmem:[#allocation2 + $0x13c] ss:$12 sps:$4 sm:$0xff]  }
  0x34   :  { %1403 = vmatpush1.bf16.msra.mxu0 %v2394_v8  ;;  %v2467_v43 = vld [vmem:[#allocation2 + $0x158] ss:$12 sps:$4 sm:$0xff]   ;;  %v53_v47 = vsub.s32 0, %v2773_v10  ;;  %v2472_v48 = vld [vmem:[#allocation2 + $0x170] ss:$12 sps:$4 sm:$0xff]   ;;  %v65_v50 = vsub.s32 3, %v2773_v10 }
  0x35   :  { %1404 = vmatprep.subr.bf16.mxu0 %v2395_v9  ;;  %v2468_v46 = vld [vmem:[#allocation2 + $0x98] ss:$12 sps:$4 sm:$0xff]   ;;  %v2425_v51 = vld [vmem:[#allocation2 + $0x154] ss:$12 sps:$4 sm:$0xff]   ;;  %v2473_v52 = vld [vmem:[#allocation2 + $0xb0] ss:$12 sps:$4 sm:$0xff]  }
  0x36   :  { %2227 = vmatpush3.bf16.msra.mxu1 %v2448_v30  ;;  %v2424_v49 = vld [vmem:[#allocation2 + $0x138] ss:$12 sps:$4 sm:$0xff]   ;;  %v54_v53 = vrot.slane %v2779_v16, %v53_v47  ;;  %v2477_v54 = vld [vmem:[#allocation2 + $0x248] ss:$12 sps:$4 sm:$0xff]   ;;  %v2427_v55 = vld [vmem:[#allocation2 + $0x150] ss:$12 sps:$4 sm:$0xff]   ;;  %v66_v57 = vrot.slane %v2779_v16, %v65_v50 }
  0x37   :  { %2228 = vmatprep.subr.bf16.mxu1 %v2452_v33  ;;  %v2428_v56 = vld [vmem:[#allocation2 + $0x16c] ss:$12 sps:$4 sm:$0xff]   ;;  %v2478_v58 = vld [vmem:[#allocation2 + $0x188] ss:$12 sps:$4 sm:$0xff]   ;;  %v2433_v63 = vld [vmem:[#allocation2 + $0x184] ss:$12 sps:$4 sm:$0xff]  }
  0x38   :  { %1405 = vmatpush1.bf16.msra.mxu0 %v2397_v11  ;;  %v91_v59 = vpack.c.bf16 %v54_v53, %v54_v53  ;;  %v2482_v60 = vld [vmem:[#allocation2 + $0x260] ss:$12 sps:$4 sm:$0xff]   ;;  %v2430_v61 = vld [vmem:[#allocation2 + $0x168] ss:$12 sps:$4 sm:$0xff]   ;;  %v94_v62 = vpack.c.bf16 %v66_v57, %v66_v57  ;;  %v2487_v1 = vld [vmem:[#allocation2 + $0x278] ss:$12 sps:$4 sm:$0xff]  }
  0x39   :  { %1406 = vmatprep.subr.bf16.mxu0 %v2398_v12  ;;  %v2483_v0 = vld [vmem:[#allocation2 + $0x1a0] ss:$12 sps:$4 sm:$0xff]   ;;  %v2436_v3 = vld [vmem:[#allocation2 + $0x19c] ss:$12 sps:$4 sm:$0xff]   ;;  %v2488_v4 = vld [vmem:[#allocation2 + $0x1b8] ss:$12 sps:$4 sm:$0xff]  }
  0x3a   :  { %2229 = vmatpush3.bf16.msra.mxu1 %v2453_v34  ;;  %v2431_v2 = vld [vmem:[#allocation2 + $0x180] ss:$12 sps:$4 sm:$0xff]   ;;  %v2492_v5 = vld [vmem:[#allocation2 + $0x290] ss:$12 sps:$4 sm:$0xff]   ;;  %v2434_v6 = vld [vmem:[#allocation2 + $0x198] ss:$12 sps:$4 sm:$0xff]  }
  0x3b   :  { %2230 = vmatprep.subr.bf16.mxu1 %v2457_v35  ;;  %v2441_v7 = vld [vmem:[#allocation2 + $0x1b4] ss:$12 sps:$4 sm:$0xff]   ;;  %v2493_v8 = vld [vmem:[#allocation2 + $0x1d0] ss:$12 sps:$4 sm:$0xff]   ;;  %v2446_v12 = vld [vmem:[#allocation2 + $0x1cc] ss:$12 sps:$4 sm:$0xff]  }
  0x3c   :  { %1407 = vmatpush1.bf16.msra.mxu0 %v2400_v14  ;;  %v2497_v9 = vld [vmem:[#allocation2 + $0x2a8] ss:$12 sps:$4 sm:$0xff]   ;;  %v2439_v11 = vld [vmem:[#allocation2 + $0x1b0] ss:$12 sps:$4 sm:$0xff]   ;;  %v2507_v20 = vld [vmem:[#allocation2 + $0x2d8] ss:$12 sps:$4 sm:$0xff]  }
  0x3d   :  { %1408 = vmatprep.subr.bf16.mxu0 %v2401_v15  ;;  %v2498_v14 = vld [vmem:[#allocation2 + $0x1e8] ss:$12 sps:$4 sm:$0xff]   ;;  %v2502_v15 = vld [vmem:[#allocation2 + $0x2c0] ss:$12 sps:$4 sm:$0xff]   ;;  %v61_v22 = vsub.s32 2, %v2773_v10  ;;  %v73_v25 = vsub.s32 5, %v2773_v10 }
  0x3e   :  { %2231 = vmatpush3.bf16.msra.mxu1 %v2458_v38  ;;  %v2444_v17 = vld [vmem:[#allocation2 + $0x1c8] ss:$12 sps:$4 sm:$0xff]   ;;  %v2449_v21 = vld [vmem:[#allocation2 + $0x1e0] ss:$12 sps:$4 sm:$0xff]   ;;  %v2512_v26 = vld [vmem:[#allocation2 + $0x2f0] ss:$12 sps:$4 sm:$0xff]  }
  0x3f   :  { %2232 = vmatprep.subr.bf16.mxu1 %v2462_v39  ;;  %v2513_v29 = vld [vmem:[#allocation2 + $0x230] ss:$12 sps:$4 sm:$0xff]   ;;  %v62_v30 = vrot.slane %v2779_v16, %v61_v22  ;;  %v2466_v34 = vld [vmem:[#allocation2 + $0x22c] ss:$12 sps:$4 sm:$0xff]   ;;  %v2518_v35 = vld [vmem:[#allocation2 + $0x308] ss:$12 sps:$4 sm:$0xff]  }
  0x40   :  { %1409 = vmatpush1.bf16.msra.mxu0 %v2403_v18  ;;  %v2451_v18 = vld [vmem:[#allocation2 + $0x1e4] ss:$12 sps:$4 sm:$0xff]   ;;  %v2464_v39 = vld [vmem:[#allocation2 + $0x228] ss:$12 sps:$4 sm:$0xff]   ;;  %v2486_v53 = vld [vmem:[#allocation2 + $0x28c] ss:$12 sps:$4 sm:$0xff]  }
  0x41   :  { %1410 = vmatprep.subr.bf16.mxu0 %v2404_v19  ;;  %v2503_v19 = vld [vmem:[#allocation2 + $0x200] ss:$12 sps:$4 sm:$0xff]   ;;  %v2459_v33 = vld [vmem:[#allocation2 + $0x210] ss:$12 sps:$4 sm:$0xff]  }
  0x42   :  { %2233 = vmatpush3.bf16.msra.mxu1 %v2463_v42  ;;  %v2527_v42 = vld [vmem:[#allocation2 + $0x3f8] ss:$12 sps:$4 sm:$0xff]   ;;  %v2533_v50 = vld [vmem:[#allocation2 + $0x350] ss:$12 sps:$4 sm:$0xff]  }
  0x43   :  { %2234 = vmatprep.subr.bf16.mxu1 %v2467_v43  ;;  %v2469_v43 = vld [vmem:[#allocation2 + $0x240] ss:$12 sps:$4 sm:$0xff]   ;;  %v2491_v57 = vld [vmem:[#allocation2 + $0x2a4] ss:$12 sps:$4 sm:$0xff]  }
  0x44   :  { %1411 = vmatpush1.bf16.msra.mxu0 %v2406_v23  ;;  %v2456_v23 = vld [vmem:[#allocation2 + $0x1fc] ss:$12 sps:$4 sm:$0xff]  }
  0x45   :  { %1412 = vmatprep.subr.bf16.mxu0 %v2407_v24  ;;  %v2508_v24 = vld [vmem:[#allocation2 + $0x218] ss:$12 sps:$4 sm:$0xff]  }
  0x46   :  { %2235 = vmatpush3.bf16.msra.mxu1 %v2468_v46  ;;  %v2532_v46 = vld [vmem:[#allocation2 + $0x410] ss:$12 sps:$4 sm:$0xff]  }
  0x47   :  { %2236 = vmatprep.subr.bf16.mxu1 %v2472_v48  ;;  %v2474_v48 = vld [vmem:[#allocation2 + $0x258] ss:$12 sps:$4 sm:$0xff]  }
  0x48   :  { %1413 = vmatpush1.bf16.msra.mxu0 %v2409_v27  ;;  %v2454_v27 = vld [vmem:[#allocation2 + $0x1f8] ss:$12 sps:$4 sm:$0xff]  }
  0x49   :  { %1414 = vmatprep.subr.bf16.mxu0 %v2410_v28  ;;  %v2461_v28 = vld [vmem:[#allocation2 + $0x214] ss:$12 sps:$4 sm:$0xff]  }
  0x4a   :  { %2237 = vmatpush3.bf16.msra.mxu1 %v2473_v52  ;;  %v2479_v52 = vld [vmem:[#allocation2 + $0x270] ss:$12 sps:$4 sm:$0xff]  }
  0x4b   :  { %2244 = vmatprep.subr.bf16.mxu1 %v2477_v54  ;;  %v2538_v54 = vld [vmem:[#allocation2 + $0x368] ss:$12 sps:$4 sm:$0xff]  }
  0x4c   :  { %1415 = vmatpush1.bf16.msra.mxu0 %v2412_v31  ;;  %v2517_v31 = vld [vmem:[#allocation2 + $0x3c8] ss:$12 sps:$4 sm:$0xff]  }
  0x4d   :  { %1416 = vmatprep.subr.bf16.mxu0 %v2413_v32  ;;  %1593 = vmatmul.mubr.bf16.vlgmr.msra.gmra.mrb[0].mxu1 %v91_v59  ;;  %v74_v32 = vrot.slane %v2779_v16, %v73_v25  ;;  %v2572_v25 = vld [vmem:[#allocation2 + $0x590] ss:$12 sps:$4 sm:$0xff]  }
  0x4e   :  { %2245 = vmatpush3.bf16.msra.mxu1 %v2478_v58  ;;  %1632 = vmatprep.mubr.bf16.mxu1 %v94_v62  ;;  %v2543_v58 = vld [vmem:[#allocation2 + $0x380] ss:$12 sps:$4 sm:$0xff]  }
  0x4f   :  { %2246 = vmatprep.subr.bf16.mxu1 %v2482_v60  ;;  %v2798_v38 = vpack.c.bf16 %v74_v32, %v74_v32  ;;  %v2489_v60 = vld [vmem:[#allocation2 + $0x2a0] ss:$12 sps:$4 sm:$0xff]   ;;  %v2578_v32 = vld [vmem:[#allocation2 + $0x4e8] ss:$12 sps:$4 sm:$0xff]  }
  0x50   :  { %1417 = vmatpush1.bf16.msra.mxu0 %v2415_v36  ;;  %v2796_v36 = vpack.c.bf16 %v62_v30, %v62_v30  ;;  %v2519_v30 = vld [vmem:[#allocation2 + $0x330] ss:$12 sps:$4 sm:$0xff]  }
  0x51   :  { %1418 = vmatprep.subr.bf16.mxu0 %v2416_v37  ;;  %v2522_v37 = vld [vmem:[#allocation2 + $0x3e0] ss:$12 sps:$4 sm:$0xff]  }
  0x52   :  { %2247 = vmatpush3.bf16.msra.mxu1 %v2483_v0  ;;  %v2552_v0 = vld [vmem:[#allocation2 + $0x470] ss:$12 sps:$4 sm:$0xff]  }
  0x53   :  { %2248 = vmatprep.subr.bf16.mxu1 %v2487_v1  ;;  %v81_v1 = vsub.s32 7, %v2773_v10 }
  0x54   :  { %1419 = vmatpush1.bf16.msra.mxu0 %v2418_v40  ;;  %v2471_v40 = vld [vmem:[#allocation2 + $0x244] ss:$12 sps:$4 sm:$0xff]  }
  0x55   :  { %1420 = vmatprep.subr.bf16.mxu0 %v2419_v41  ;;  %v2523_v41 = vld [vmem:[#allocation2 + $0x320] ss:$12 sps:$4 sm:$0xff]  }
  0x56   :  { %2249 = vmatpush3.bf16.msra.mxu1 %v2488_v4 }
  0x57   :  { %2250 = vmatprep.subr.bf16.mxu1 %v2492_v5  ;;  %v2553_v5 = vld [vmem:[#allocation2 + $0x3b0] ss:$12 sps:$4 sm:$0xff]  }
  0x58   :  { %1421 = vmatpush1.bf16.msra.mxu0 %v2421_v44  ;;  %v2476_v44 = vld [vmem:[#allocation2 + $0x25c] ss:$12 sps:$4 sm:$0xff]  }
  0x59   :  { %1422 = vmatprep.subr.bf16.mxu0 %v2422_v45  ;;  %v2528_v45 = vld [vmem:[#allocation2 + $0x338] ss:$12 sps:$4 sm:$0xff]  }
  0x5a   :  { %2251 = vmatpush3.bf16.msra.mxu1 %v2493_v8  ;;  %v2499_v8 = vld [vmem:[#allocation2 + $0x2d0] ss:$12 sps:$4 sm:$0xff]  }
  0x5b   :  { %2252 = vmatprep.subr.bf16.mxu1 %v2497_v9 }
  0x5c   :  { %1423 = vmatpush1.bf16.msra.mxu0 %v2424_v49  ;;  %v2481_v49 = vld [vmem:[#allocation2 + $0x274] ss:$12 sps:$4 sm:$0xff]  }
  0x5d   :  { %1424 = vmatprep.subr.bf16.mxu0 %v2425_v51  ;;  %v2537_v51 = vld [vmem:[#allocation2 + $0x428] ss:$12 sps:$4 sm:$0xff]  }
  0x5e   :  { %2253 = vmatpush3.bf16.msra.mxu1 %v2498_v14  ;;  %v2562_v14 = vld [vmem:[#allocation2 + $0x560] ss:$12 sps:$4 sm:$0xff]  }
  0x5f   :  { %2254 = vmatprep.subr.bf16.mxu1 %v2502_v15 }
  0x60   :  { %1425 = vmatpush1.bf16.msra.mxu0 %v2427_v55  ;;  %v2542_v55 = vld [vmem:[#allocation2 + $0x440] ss:$12 sps:$4 sm:$0xff]  }
  0x61   :  { %1426 = vmatprep.subr.bf16.mxu0 %v2428_v56  ;;  %v2484_v56 = vld [vmem:[#allocation2 + $0x288] ss:$12 sps:$4 sm:$0xff]  }
  0x62   :  { %2255 = vmatpush3.bf16.msra.mxu1 %v2503_v19  ;;  %v2563_v19 = vld [vmem:[#allocation2 + $0x4a0] ss:$12 sps:$4 sm:$0xff]  }
  0x63   :  { %2256 = vmatprep.subr.bf16.mxu1 %v2507_v20  ;;  %v2567_v20 = vld [vmem:[#allocation2 + $0x578] ss:$12 sps:$4 sm:$0xff]  }
  0x64   :  { %1427 = vmatpush1.bf16.msra.mxu0 %v2430_v61  ;;  %v69_v61 = vsub.s32 4, %v2773_v10 }
  0x65   :  { %1437 = vmatprep.subr.bf16.mxu0 %v2433_v63  ;;  %v2548_v63 = vld [vmem:[#allocation2 + $0x398] ss:$12 sps:$4 sm:$0xff]  }
  0x66   :  { %2257 = vmatpush3.bf16.msra.mxu1 %v2508_v24  ;;  %v70_v4 = vrot.slane %v2779_v16, %v69_v61  ;;  %v2568_v24 = vld [vmem:[#allocation2 + $0x4b8] ss:$12 sps:$4 sm:$0xff]   ;;  %v2576_v61 = vld [vmem:[#allocation2 + $0x43c] ss:$12 sps:$4 sm:$0xff]  }
  0x67   :  { %1429 = vmatmul.mubr.bf16.vlgmr.msra.gmra.mrb[0].mxu0 %v91_v59  ;;  %2258 = vmatprep.subr.bf16.mxu1 %v2512_v26  ;;  %v2547_v59 = vld [vmem:[#allocation2 + $0x458] ss:$12 sps:$4 sm:$0xff]  }
  0x68   :  { %1438 = vmatpush1.bf16.msra.mxu0 %v2431_v2  ;;  %1469 = vmatprep.mubr.bf16.mxu0 %v94_v62  ;;  %v2496_v62 = vld [vmem:[#allocation2 + $0x2bc] ss:$12 sps:$4 sm:$0xff]   ;;  %v2494_v2 = vld [vmem:[#allocation2 + $0x2b8] ss:$12 sps:$4 sm:$0xff]   ;;  %v2806_v9 = vpack.c.bf16 %v70_v4, %v70_v4  ;;  %v2589_v4 = vld [vmem:[#allocation2 + $0x480] ss:$12 sps:$4 sm:$0xff]  }
  0x69   :  { %1439 = vmatprep.subr.bf16.mxu0 %v2436_v3  ;;  %v2501_v3 = vld [vmem:[#allocation2 + $0x2d4] ss:$12 sps:$4 sm:$0xff]   ;;  %v2514_v26 = vld [vmem:[#allocation2 + $0x318] ss:$12 sps:$4 sm:$0xff]  }
  0x6a   :  { %2259 = vmatpush3.bf16.msra.mxu1 %v2513_v29  ;;  %v2577_v29 = vld [vmem:[#allocation2 + $0x5a8] ss:$12 sps:$4 sm:$0xff]  }
  0x6b   :  { %2266 = vmatprep.subr.bf16.mxu1 %v2517_v31  ;;  %v2526_v31 = vld [vmem:[#allocation2 + $0x34c] ss:$12 sps:$4 sm:$0xff]  }
  0x6c   :  { %1440 = vmatpush1.bf16.msra.mxu0 %v2434_v6  ;;  %v2557_v6 = vld [vmem:[#allocation2 + $0x548] ss:$12 sps:$4 sm:$0xff]  }
  0x6d   :  { %1441 = vmatprep.subr.bf16.mxu0 %v2441_v7  ;;  %1633 = vmatmul.mubr.bf16.vlgmr.msra.gmra.mrb[4].mxu1 %v2796_v36  ;;  %v82_v7 = vrot.slane %v2779_v16, %v81_v1  ;;  %v2586_v1 = vld [vmem:[#allocation2 + $0x46c] ss:$12 sps:$4 sm:$0xff]  }
  0x6e   :  { %2267 = vmatpush3.bf16.msra.mxu1 %v2518_v35  ;;  %1672 = vmatprep.mubr.bf16.mxu1 %v2798_v38  ;;  %v2531_v35 = vld [vmem:[#allocation2 + $0x364] ss:$12 sps:$4 sm:$0xff]  }
  0x6f   :  { %2268 = vmatprep.subr.bf16.mxu1 %v2522_v37  ;;  %v2808_v15 = vpack.c.bf16 %v82_v7, %v82_v7  ;;  %v2587_v37 = vld [vmem:[#allocation2 + $0x5d8] ss:$12 sps:$4 sm:$0xff]   ;;  %v2599_v7 = vld [vmem:[#allocation2 + $0x4b4] ss:$12 sps:$4 sm:$0xff]  }
  0x70   :  { %1442 = vmatpush1.bf16.msra.mxu0 %v2439_v11  ;;  %v2506_v11 = vld [vmem:[#allocation2 + $0x2ec] ss:$12 sps:$4 sm:$0xff]  }
  0x71   :  { %1443 = vmatprep.subr.bf16.mxu0 %v2446_v12  ;;  %v2558_v12 = vld [vmem:[#allocation2 + $0x488] ss:$12 sps:$4 sm:$0xff]  }
  0x72   :  { %2269 = vmatpush3.bf16.msra.mxu1 %v2523_v41  ;;  %v2588_v41 = vld [vmem:[#allocation2 + $0x518] ss:$12 sps:$4 sm:$0xff]  }
  0x73   :  { %2270 = vmatprep.subr.bf16.mxu1 %v2527_v42  ;;  %v2592_v42 = vld [vmem:[#allocation2 + $0x5f0] ss:$12 sps:$4 sm:$0xff]  }
  0x74   :  { %1444 = vmatpush1.bf16.msra.mxu0 %v2444_v17  ;;  %v2504_v17 = vld [vmem:[#allocation2 + $0x2e8] ss:$12 sps:$4 sm:$0xff]  }
  0x75   :  { %1445 = vmatprep.subr.bf16.mxu0 %v2451_v18  ;;  %v2511_v18 = vld [vmem:[#allocation2 + $0x304] ss:$12 sps:$4 sm:$0xff]  }
  0x76   :  { %2271 = vmatpush3.bf16.msra.mxu1 %v2528_v45 }
  0x77   :  { %2272 = vmatprep.subr.bf16.mxu1 %v2532_v46  ;;  %v2593_v46 = vld [vmem:[#allocation2 + $0x530] ss:$12 sps:$4 sm:$0xff]  }
  0x78   :  { %1446 = vmatpush1.bf16.msra.mxu0 %v2449_v21  ;;  %v2509_v21 = vld [vmem:[#allocation2 + $0x300] ss:$12 sps:$4 sm:$0xff]  }
  0x79   :  { %1447 = vmatprep.subr.bf16.mxu0 %v2456_v23  ;;  %v2516_v23 = vld [vmem:[#allocation2 + $0x31c] ss:$12 sps:$4 sm:$0xff]  }
  0x7a   :  { %2273 = vmatpush3.bf16.msra.mxu1 %v2533_v50 }
  0x7b   :  { %2274 = vmatprep.subr.bf16.mxu1 %v2537_v51  ;;  %v2544_v51 = vld [vmem:[#allocation2 + $0x3a8] ss:$12 sps:$4 sm:$0xff]  }
  0x7c   :  { %1448 = vmatpush1.bf16.msra.mxu0 %v2454_v27  ;;  %v2521_v27 = vld [vmem:[#allocation2 + $0x334] ss:$12 sps:$4 sm:$0xff]  }
  0x7d   :  { %1449 = vmatprep.subr.bf16.mxu0 %v2461_v28  ;;  %v2573_v28 = vld [vmem:[#allocation2 + $0x4d0] ss:$12 sps:$4 sm:$0xff]  }
  0x7e   :  { %2275 = vmatpush3.bf16.msra.mxu1 %v2538_v54  ;;  %v2556_v54 = vld [vmem:[#allocation2 + $0x3dc] ss:$12 sps:$4 sm:$0xff]  }
  0x7f   :  { %2276 = vmatprep.subr.bf16.mxu1 %v2542_v55  ;;  %v2561_v55 = vld [vmem:[#allocation2 + $0x3f4] ss:$12 sps:$4 sm:$0xff]  }
  0x80   :  { %1450 = vmatpush1.bf16.msra.mxu0 %v2459_v33  ;;  %v2582_v33 = vld [vmem:[#allocation2 + $0x5c0] ss:$12 sps:$4 sm:$0xff]  }
  0x81   :  { %1451 = vmatprep.subr.bf16.mxu0 %v2466_v34  ;;  %v2524_v34 = vld [vmem:[#allocation2 + $0x348] ss:$12 sps:$4 sm:$0xff]  }
  0x82   :  { %2277 = vmatpush3.bf16.msra.mxu1 %v2543_v58  ;;  %v2564_v58 = vld [vmem:[#allocation2 + $0x408] ss:$12 sps:$4 sm:$0xff]  }
  0x83   :  { %2278 = vmatprep.subr.bf16.mxu1 %v2547_v59  ;;  %v2571_v59 = vld [vmem:[#allocation2 + $0x424] ss:$12 sps:$4 sm:$0xff]  }
  0x84   :  { %1452 = vmatpush1.bf16.msra.mxu0 %v2464_v39  ;;  %v2536_v39 = vld [vmem:[#allocation2 + $0x37c] ss:$12 sps:$4 sm:$0xff]  }
  0x85   :  { %1453 = vmatprep.subr.bf16.mxu0 %v2471_v40  ;;  %v77_v40 = vsub.s32 6, %v2773_v10  ;;  %v2657_v10 = vld [vmem:[#allocation4 + $0x90] sm:$0xff]  }
  0x86   :  { %2279 = vmatpush3.bf16.msra.mxu1 %v2548_v63  ;;  %v2581_v63 = vld [vmem:[#allocation2 + $0x454] ss:$12 sps:$4 sm:$0xff]  }
  0x87   :  { %2280 = vmatprep.subr.bf16.mxu1 %v2552_v0  ;;  %v78_v45 = vrot.slane %v2779_v16, %v77_v40  ;;  %v2554_v16 = vld [vmem:[#allocation2 + $0x3d8] ss:$12 sps:$4 sm:$0xff]   ;;  %v2579_v0 = vld [vmem:[#allocation2 + $0x450] ss:$12 sps:$4 sm:$0xff]  }
  0x88   :  { %1454 = vmatpush1.bf16.msra.mxu0 %v2469_v43  ;;  %v2534_v43 = vld [vmem:[#allocation2 + $0x378] ss:$12 sps:$4 sm:$0xff]  }
  0x89   :  { %1455 = vmatprep.subr.bf16.mxu0 %v2476_v44  ;;  %v2541_v44 = vld [vmem:[#allocation2 + $0x394] ss:$12 sps:$4 sm:$0xff]   ;;  %v2816_v50 = vpack.c.bf16 %v78_v45, %v78_v45  ;;  %v2638_v40 = vld [vmem:[#allocation2 + $0x5ec] ss:$12 sps:$4 sm:$0xff]  }
  0x8a   :  { %2281 = vmatpush3.bf16.msra.mxu1 %v2553_v5  ;;  %v2596_v5 = vld [vmem:[#allocation2 + $0x49c] ss:$12 sps:$4 sm:$0xff]  }
  0x8b   :  { %2288 = vmatprep.subr.bf16.mxu1 %v2557_v6  ;;  %v2594_v6 = vld [vmem:[#allocation2 + $0x498] ss:$12 sps:$4 sm:$0xff]  }
  0x8c   :  { %1456 = vmatpush1.bf16.msra.mxu0 %v2474_v48  ;;  %v2539_v48 = vld [vmem:[#allocation2 + $0x390] ss:$12 sps:$4 sm:$0xff]  }
  0x8d   :  { %1457 = vmatprep.subr.bf16.mxu0 %v2481_v49  ;;  %1673 = vmatmul.mubr.bf16.vlgmr.msra.gmra.mrb[8].mxu1 %v2806_v9  ;;  %v2546_v49 = vld [vmem:[#allocation2 + $0x3ac] ss:$12 sps:$4 sm:$0xff]  }
  0x8e   :  { %2289 = vmatpush3.bf16.msra.mxu1 %v2558_v12  ;;  %1712 = vmatprep.mubr.bf16.mxu1 %v2808_v15  ;;  %v2600_v12 = vld [vmem:[#allocation2 + $0x4c8] ss:$12 sps:$4 sm:$0xff]   ;;  %v2645_v45 = vld [vmem:[#allocation4 + $0x58] sm:$0xff]  }
  0x8f   :  { %2290 = vmatprep.subr.bf16.mxu1 %v2562_v14  ;;  %v2605_v14 = vld [vmem:[#allocation2 + $0x4e4] ss:$12 sps:$4 sm:$0xff]  }
  0x90   :  { %1458 = vmatpush1.bf16.msra.mxu0 %v2479_v52  ;;  %v2551_v52 = vld [vmem:[#allocation2 + $0x3c4] ss:$12 sps:$4 sm:$0xff]  }
  0x91   :  { %1459 = vmatprep.subr.bf16.mxu0 %v2486_v53  ;;  %v2549_v53 = vld [vmem:[#allocation2 + $0x3c0] ss:$12 sps:$4 sm:$0xff]  }
  0x92   :  { %2291 = vmatpush3.bf16.msra.mxu1 %v2563_v19  ;;  %v2611_v19 = vld [vmem:[#allocation2 + $0x514] ss:$12 sps:$4 sm:$0xff]  }
  0x93   :  { %2292 = vmatprep.subr.bf16.mxu1 %v2567_v20  ;;  %v2614_v20 = vld [vmem:[#allocation2 + $0x52c] ss:$12 sps:$4 sm:$0xff]  }
  0x94   :  { %1460 = vmatpush1.bf16.msra.mxu0 %v2484_v56  ;;  %v2559_v56 = vld [vmem:[#allocation2 + $0x3f0] ss:$12 sps:$4 sm:$0xff]  }
  0x95   :  { %1461 = vmatprep.subr.bf16.mxu0 %v2491_v57  ;;  %v2566_v57 = vld [vmem:[#allocation2 + $0x40c] ss:$12 sps:$4 sm:$0xff]  }
  0x96   :  { %2293 = vmatpush3.bf16.msra.mxu1 %v2568_v24  ;;  %v2615_v24 = vld [vmem:[#allocation2 + $0x540] ss:$12 sps:$4 sm:$0xff]  }
  0x97   :  { %2294 = vmatprep.subr.bf16.mxu1 %v2572_v25  ;;  %v2620_v25 = vld [vmem:[#allocation2 + $0x55c] ss:$12 sps:$4 sm:$0xff]  }
  0x98   :  { %1462 = vmatpush1.bf16.msra.mxu0 %v2489_v60  ;;  %v2569_v60 = vld [vmem:[#allocation2 + $0x420] ss:$12 sps:$4 sm:$0xff]  }
  0x99   :  { %1463 = vmatprep.subr.bf16.mxu0 %v2496_v62  ;;  %v2574_v62 = vld [vmem:[#allocation2 + $0x438] ss:$12 sps:$4 sm:$0xff]  }
  0x9a   :  { %2295 = vmatpush3.bf16.msra.mxu1 %v2573_v28  ;;  %v2621_v28 = vld [vmem:[#allocation2 + $0x570] ss:$12 sps:$4 sm:$0xff]  }
  0x9b   :  { %2296 = vmatprep.subr.bf16.mxu1 %v2577_v29  ;;  %v2626_v29 = vld [vmem:[#allocation2 + $0x58c] ss:$12 sps:$4 sm:$0xff]  }
  0x9c   :  { %1464 = vmatpush1.bf16.msra.mxu0 %v2494_v2  ;;  %v2584_v2 = vld [vmem:[#allocation2 + $0x468] ss:$12 sps:$4 sm:$0xff]  }
  0x9d   :  { %1465 = vmatprep.subr.bf16.mxu0 %v2501_v3  ;;  %v2591_v3 = vld [vmem:[#allocation2 + $0x484] ss:$12 sps:$4 sm:$0xff]  }
  0x9e   :  { %2297 = vmatpush3.bf16.msra.mxu1 %v2578_v32  ;;  %v2627_v32 = vld [vmem:[#allocation2 + $0x5a0] ss:$12 sps:$4 sm:$0xff]  }
  0x9f   :  { %2298 = vmatprep.subr.bf16.mxu1 %v2582_v33  ;;  %v2632_v33 = vld [vmem:[#allocation2 + $0x5bc] ss:$12 sps:$4 sm:$0xff]  }
  0xa0   :  { %1466 = vmatpush1.bf16.msra.mxu0 %v2499_v8  ;;  %v2597_v8 = vld [vmem:[#allocation2 + $0x4b0] ss:$12 sps:$4 sm:$0xff]  }
  0xa1   :  { %1467 = vmatprep.subr.bf16.mxu0 %v2506_v11  ;;  %v2602_v11 = vld [vmem:[#allocation2 + $0x4cc] ss:$12 sps:$4 sm:$0xff]  }
  0xa4   :  { %1468 = vmatpush1.bf16.msra.mxu0 %v2504_v17  ;;  %v2603_v17 = vld [vmem:[#allocation2 + $0x4e0] ss:$12 sps:$4 sm:$0xff]  }
  0xa5   :  { %1478 = vmatprep.subr.bf16.mxu0 %v2511_v18  ;;  %v2608_v18 = vld [vmem:[#allocation2 + $0x4fc] ss:$12 sps:$4 sm:$0xff]  }
  0xa7   :  { %1470 = vmatmul.mubr.bf16.vlgmr.msra.gmra.mrb[0].mxu0 %v2796_v36  ;;  %v2583_v36 = vld [vmem:[#allocation2 + $0x500] ss:$12 sps:$4 sm:$0xff]  }
  0xa8   :  { %1479 = vmatpush1.bf16.msra.mxu0 %v2509_v21  ;;  %1510 = vmatprep.mubr.bf16.mxu0 %v2798_v38  ;;  %v2529_v38 = vld [vmem:[#allocation2 + $0x360] ss:$12 sps:$4 sm:$0xff]   ;;  %v2612_v21 = vld [vmem:[#allocation2 + $0x528] ss:$12 sps:$4 sm:$0xff]  }
  0xa9   :  { %1480 = vmatprep.subr.bf16.mxu0 %v2516_v23  ;;  %2299 = vmatpush3.bf16.msra.mxu1 %v2583_v36  ;;  %v2617_v23 = vld [vmem:[#allocation2 + $0x544] ss:$12 sps:$4 sm:$0xff]  }
  0xaa   :  { %2300 = vmatprep.subr.bf16.mxu1 %v2587_v37  ;;  %v2639_v36 = vld [vmem:[#allocation4 + $0x40] sm:$0xff]  }
  0xab   :  { %v2640_v37 = vld [vmem:[#allocation4] sm:$0xff]  }
  0xac   :  { %1481 = vmatpush1.bf16.msra.mxu0 %v2514_v26  ;;  %v2618_v26 = vld [vmem:[#allocation2 + $0x558] ss:$12 sps:$4 sm:$0xff]  }
  0xad   :  { %1482 = vmatprep.subr.bf16.mxu0 %v2521_v27  ;;  %2301 = vmatpush3.bf16.msra.mxu1 %v2588_v41  ;;  %v2623_v27 = vld [vmem:[#allocation2 + $0x574] ss:$12 sps:$4 sm:$0xff]   ;;  %v2642_v41 = vld [vmem:[#allocation4 + $0x8] sm:$0xff]  }
  0xae   :  { %2302 = vmatprep.subr.bf16.mxu1 %v2592_v42  ;;  %v2643_v42 = vld [vmem:[#allocation4 + $0x50] sm:$0xff]  }
  0xb0   :  { %1483 = vmatpush1.bf16.msra.mxu0 %v2519_v30  ;;  %v2624_v30 = vld [vmem:[#allocation2 + $0x588] ss:$12 sps:$4 sm:$0xff]  }
  0xb1   :  { %1484 = vmatprep.subr.bf16.mxu0 %v2526_v31  ;;  %2303 = vmatpush3.bf16.msra.mxu1 %v2593_v46  ;;  %v2629_v31 = vld [vmem:[#allocation2 + $0x5a4] ss:$12 sps:$4 sm:$0xff]   ;;  %v2646_v46 = vld [vmem:[#allocation4 + $0x18] sm:$0xff]  }
  0xb2   :  { %2310 = vmatprep.subr.bf16.mxu1 %v2639_v36  ;;  %v2661_v36 = vld [vmem:[#allocation4 + $0xb0] sm:$0xff]  }
  0xb4   :  { %1485 = vmatpush1.bf16.msra.mxu0 %v2524_v34  ;;  %1713 = vmatmul.mubr.bf16.vlgmr.msra.gmra.mrb[12].mxu1 %v2816_v50  ;;  %v2630_v34 = vld [vmem:[#allocation2 + $0x5b8] ss:$12 sps:$4 sm:$0xff]  }
  0xb5   :  { %1486 = vmatprep.subr.bf16.mxu0 %v2531_v35  ;;  %v2635_v35 = vld [vmem:[#allocation2 + $0x5d4] ss:$12 sps:$4 sm:$0xff]   ;;  %2311 = vmatpush3.bf16.msra.mxu1 %v2640_v37  ;;  %v2662_v37 = vld [vmem:[#allocation4 + $0xb8] sm:$0xff]  }
  0xb8   :  { %1487 = vmatpush1.bf16.msra.mxu0 %v2529_v38  ;;  %v2641_v38 = vld [vmem:[#allocation4 + $0x48] sm:$0xff]  }
  0xb9   :  { %1488 = vmatprep.subr.bf16.mxu0 %v2536_v39  ;;  %v2633_v39 = vld [vmem:[#allocation2 + $0x5d0] ss:$12 sps:$4 sm:$0xff]   ;;  %2312 = vmatprep.subr.bf16.mxu1 %v2641_v38 }
  0xba   :  { %2313 = vmatpush3.bf16.msra.mxu1 %v2642_v41 }
  0xbb   :  { %2314 = vmatprep.subr.bf16.mxu1 %v2643_v42 }
  0xbc   :  { %1489 = vmatpush1.bf16.msra.mxu0 %v2534_v43  ;;  %v2636_v43 = vld [vmem:[#allocation2 + $0x5e8] ss:$12 sps:$4 sm:$0xff]  }
  0xbd   :  { %1490 = vmatprep.subr.bf16.mxu0 %v2541_v44  ;;  %v2644_v44 = vld [vmem:[#allocation4 + $0x10] sm:$0xff]  }
  0xbe   :  { %2315 = vmatpush3.bf16.msra.mxu1 %v2644_v44 }
  0xbf   :  { %2316 = vmatprep.subr.bf16.mxu1 %v2645_v45  ;;  %v1774_v45 = vld [vmem:[%s2841_s4] sm:$0x1] }
  0xc0   :  { %1491 = vmatpush1.bf16.msra.mxu0 %v2539_v48  ;;  %v2647_v48 = vld [vmem:[#allocation4 + $0x60] sm:$0xff]  }
  0xc1   :  { %1492 = vmatprep.subr.bf16.mxu0 %v2546_v49  ;;  %v2648_v49 = vld [vmem:[#allocation4 + $0x20] sm:$0xff]  }
  0xc2   :  { %2317 = vmatpush3.bf16.msra.mxu1 %v2646_v46 }
  0xc3   :  { %2318 = vmatprep.subr.bf16.mxu1 %v2647_v48 }
  0xc4   :  { %1493 = vmatpush1.bf16.msra.mxu0 %v2544_v51  ;;  %v2649_v51 = vld [vmem:[#allocation4 + $0x68] sm:$0xff]  }
  0xc5   :  { %1494 = vmatprep.subr.bf16.mxu0 %v2551_v52  ;;  %v2650_v52 = vld [vmem:[#allocation4 + $0x28] sm:$0xff]  }
  0xc6   :  { %2319 = vmatpush3.bf16.msra.mxu1 %v2648_v49 }
  0xc7   :  { %2320 = vmatprep.subr.bf16.mxu1 %v2649_v51 }
  0xc8   :  { %1495 = vmatpush1.bf16.msra.mxu0 %v2549_v53 }
  0xc9   :  { %1496 = vmatprep.subr.bf16.mxu0 %v2556_v54 }
  0xca   :  { %2321 = vmatpush3.bf16.msra.mxu1 %v2650_v52 }
  0xcc   :  { %1497 = vmatpush1.bf16.msra.mxu0 %v2554_v16 }
  0xcd   :  { %1498 = vmatprep.subr.bf16.mxu0 %v2561_v55 }
  0xd0   :  { %1499 = vmatpush1.bf16.msra.mxu0 %v2559_v56 }
  0xd1   :  { %1500 = vmatprep.subr.bf16.mxu0 %v2566_v57  ;;  %v355_v57 = vld [vmem:[%s2839_s2] sm:$0x7] }
  0xd4   :  { %1501 = vmatpush1.bf16.msra.mxu0 %v2564_v58 }
  0xd5   :  { %1502 = vmatprep.subr.bf16.mxu0 %v2571_v59 }
  0xd8   :  { %1503 = vmatpush1.bf16.msra.mxu0 %v2569_v60 }
  0xd9   :  { %1504 = vmatprep.subr.bf16.mxu0 %v2576_v61 }
  0xdc   :  { %1505 = vmatpush1.bf16.msra.mxu0 %v2574_v62 }
  0xdd   :  { %1506 = vmatprep.subr.bf16.mxu0 %v2581_v63 }
  0xe0   :  { %1507 = vmatpush1.bf16.msra.mxu0 %v2579_v0 }
  0xe1   :  { %1508 = vmatprep.subr.bf16.mxu0 %v2586_v1 }
  0xe4   :  { %1509 = vmatpush1.bf16.msra.mxu0 %v2584_v2 }
  0xe5   :  { %1519 = vmatprep.subr.bf16.mxu0 %v2591_v3 }
  0xe7   :  { %1511 = vmatmul.mubr.bf16.vlgmr.msra.gmra.mrb[0].mxu0 %v2806_v9  ;;  %v2606_v9 = vld [vmem:[#allocation2 + $0x4f8] ss:$12 sps:$4 sm:$0xff]  }
  0xe8   :  { %1520 = vmatpush1.bf16.msra.mxu0 %v2589_v4  ;;  %1551 = vmatprep.mubr.bf16.mxu0 %v2808_v15  ;;  %v2609_v15 = vld [vmem:[#allocation2 + $0x510] ss:$12 sps:$4 sm:$0xff]  }
  0xe9   :  { %1521 = vmatprep.subr.bf16.mxu0 %v2596_v5 }
  0xec   :  { %1522 = vmatpush1.bf16.msra.mxu0 %v2594_v6 }
  0xed   :  { %1523 = vmatprep.subr.bf16.mxu0 %v2599_v7  ;;  %v2651_v7 = vld [vmem:[#allocation4 + $0x70] sm:$0xff]  }
  0xee   :  { %2322 = vmatprep.subr.bf16.mxu1 %v2651_v7 }
  0xf0   :  { %1524 = vmatpush1.bf16.msra.mxu0 %v2597_v8  ;;  %v2652_v8 = vld [vmem:[#allocation4 + $0x30] sm:$0xff]  }
  0xf1   :  { %1525 = vmatprep.subr.bf16.mxu0 %v2602_v11  ;;  %2323 = vmatpush3.bf16.msra.mxu1 %v2652_v8  ;;  %v2653_v11 = vld [vmem:[#allocation4 + $0x78] sm:$0xff]  }
  0xf2   :  { %2324 = vmatprep.subr.bf16.mxu1 %v2653_v11 }
  0xf4   :  { %1526 = vmatpush1.bf16.msra.mxu0 %v2600_v12  ;;  %v2654_v12 = vld [vmem:[#allocation4 + $0x38] sm:$0xff]  }
  0xf5   :  { %1527 = vmatprep.subr.bf16.mxu0 %v2605_v14  ;;  %2325 = vmatpush3.bf16.msra.mxu1 %v2654_v12 }
  0xf8   :  { %1528 = vmatpush1.bf16.msra.mxu0 %v2603_v17 }
  0xf9   :  { %1529 = vmatprep.subr.bf16.mxu0 %v2608_v18 }
  0xfc   :  { %1530 = vmatpush1.bf16.msra.mxu0 %v2606_v9 }
  0xfd   :  { %1531 = vmatprep.subr.bf16.mxu0 %v2611_v19 }
 0x100   :  { %1532 = vmatpush1.bf16.msra.mxu0 %v2609_v15 }
 0x101   :  { %1533 = vmatprep.subr.bf16.mxu0 %v2614_v20  ;;  %v1384_v20 = vrot.slane %v355_v57, %v53_v47  ;;  %v2659_v47 = vld [vmem:[#allocation4 + $0xa0] sm:$0xff]  }
 0x104   :  { %1534 = vmatpush1.bf16.msra.mxu0 %v2612_v21  ;;  %v1388_v21 = vrot.slane %v355_v57, %v57_v13  ;;  %v2658_v13 = vld [vmem:[#allocation4 + $0x98] sm:$0xff]  }
 0x105   :  { %1535 = vmatprep.subr.bf16.mxu0 %v2617_v23 }
 0x108   :  { %1536 = vmatpush1.bf16.msra.mxu0 %v2615_v24 }
 0x109   :  { %1537 = vmatprep.subr.bf16.mxu0 %v2620_v25 }
 0x10c   :  { %1538 = vmatpush1.bf16.msra.mxu0 %v2618_v26 }
 0x10d   :  { %1539 = vmatprep.subr.bf16.mxu0 %v2623_v27 }
 0x110   :  { %1540 = vmatpush1.bf16.msra.mxu0 %v2621_v28 }
 0x111   :  { %1541 = vmatprep.subr.bf16.mxu0 %v2626_v29 }
 0x114   :  { %1542 = vmatpush1.bf16.msra.mxu0 %v2624_v30 }
 0x115   :  { %1543 = vmatprep.subr.bf16.mxu0 %v2629_v31 }
 0x118   :  { %1544 = vmatpush1.bf16.msra.mxu0 %v2627_v32  ;;  %v2655_v32 = vld [vmem:[#allocation4 + $0x80] sm:$0xff]  }
 0x119   :  { %1545 = vmatprep.subr.bf16.mxu0 %v2632_v33 }
 0x11c   :  { %1546 = vmatpush1.bf16.msra.mxu0 %v2630_v34  ;;  %v2656_v34 = vld [vmem:[#allocation4 + $0x88] sm:$0xff]  }
 0x11d   :  { %1547 = vmatprep.subr.bf16.mxu0 %v2635_v35  ;;  %v2660_v35 = vld [vmem:[#allocation4 + $0xa8] sm:$0xff]  }
 0x120   :  { %1548 = vmatpush1.bf16.msra.mxu0 %v2633_v39  ;;  %v2238_v53 = vpop.f32.mrb[0].mxu1 }
 0x121   :  { %1549 = vmatprep.subr.bf16.mxu0 %v2638_v40  ;;  %v2239_v54 = vpop.f32.mrb[1].mxu1 }
 0x122   :  { %v2240_v16 = vadd.f32 %v2239_v54, %v2238_v53  ;;  %v2241_v55 = vpop.f32.mrb[2].mxu1 }
 0x123   :  { %v2242_v56 = vpop.f32.mrb[3].mxu1 }
 0x124   :  { %1550 = vmatpush1.bf16.msra.mxu0 %v2636_v43 }
 0x127   :  { %1552 = vmatmul.mubr.bf16.vlgmr.msra.gmra.mrb[0].mxu0 %v2816_v50  ;;  %v1392_v50 = vrot.slane %v355_v57, %v61_v22  ;;  %v2717_v22 = vmov 0.0  }
 0x128   :  { %2341 = vmatprep.subr.bf16.mxu1 %v2717_v22 }
 0x129   :  { %v1595_v58 = vadd.f32 %v2240_v16, %v1392_v50 }
 0x140   :  { %v2260_v59 = vpop.f32.mrb[4].mxu1 }
 0x141   :  { %v2261_v60 = vpop.f32.mrb[5].mxu1 }
 0x142   :  { %v2262_v61 = vadd.f32 %v2261_v60, %v2260_v59  ;;  %v2263_v62 = vpop.f32.mrb[6].mxu1 }
 0x143   :  { %v2264_v63 = vpop.f32.mrb[7].mxu1 }
 0x144   :  { %v1635_v0 = vadd.f32 %v2262_v61, %v1595_v58 }
 0x160   :  { %v2282_v1 = vpop.f32.mrb[8].mxu1 }
 0x161   :  { %v2283_v2 = vpop.f32.mrb[9].mxu1 }
 0x162   :  { %v2284_v3 = vadd.f32 %v2283_v2, %v2282_v1  ;;  %v2285_v4 = vpop.f32.mrb[10].mxu1 }
 0x163   :  { %v2286_v5 = vpop.f32.mrb[11].mxu1 }
 0x164   :  { %v1675_v6 = vadd.f32 %v2284_v3, %v1635_v0 }
 0x187   :  { %v2304_v14 = vpop.f32.mrb[12].mxu1 }
 0x188   :  { %v2305_v17 = vpop.f32.mrb[13].mxu1 }
 0x189   :  { %v2306_v18 = vadd.f32 %v2305_v17, %v2304_v14  ;;  %v2307_v9 = vpop.f32.mrb[14].mxu1 }
 0x18a   :  { %v2308_v19 = vpop.f32.mrb[15].mxu1 }
 0x18b   :  { %v1715_v15 = vadd.f32 %v2306_v18, %v1675_v6 }
 0x18d   :  { %v1722_v38 = vmax.f32 %v1715_v15, 0.0 }
 0x18f   :  { %v1725_v39 = vpack.c.bf16 %v1722_v38, %v1722_v38 }
 0x1fa   :  { %v1553_v23 = vpop.f32.mrb[0].mxu0 }
 0x1fb   :  { %v2361_v24 = vadd.f32 %v1553_v23, %v1384_v20  ;;  %v1555_v25 = vpop.f32.mrb[1].mxu0 }
 0x1fc   :  { %v2362_v26 = vadd.f32 %v1555_v25, %v1388_v21  ;;  %v1557_v27 = vpop.f32.mrb[2].mxu0 }
 0x1fd   :  { %v1720_v28 = vmax.f32 %v2361_v24, 0.0  ;;  %v1558_v29 = vpop.f32.mrb[3].mxu0 }
 0x1fe   :  { %v1721_v30 = vmax.f32 %v2362_v26, 0.0 }
 0x1ff   :  { %v1723_v33 = vpack.c.bf16 %v1720_v28, %v1720_v28 }
 0x200   :  { %v1724_v31 = vpack.c.bf16 %v1721_v30, %v1721_v30 }
 0x202   :  { %1951 = vmatprep.mubr.bf16.mxu1 %v1724_v31 }
 0x203   :  { %1952 = vmatmul.mubr.bf16.vlgmr.msra.gmra.mrb[16].mxu1 %v1723_v33 }
 0x204   :  { %2342 = vmatpush3.bf16.msra.mxu1 %v2655_v32  ;;  %2357 = vmatprep.mubr.msk.bf16.mxu1 %vm2718_vm0, %v2717_v22 }
 0x205   :  { %2343 = vmatprep.subr.bf16.mxu1 %v2717_v22 }
 0x208   :  { %2344 = vmatpush3.bf16.msra.mxu1 %v2656_v34 }
 0x209   :  { %2345 = vmatprep.subr.bf16.mxu1 %v2717_v22 }
 0x20c   :  { %2346 = vmatpush3.bf16.msra.mxu1 %v2657_v10 }
 0x20d   :  { %2347 = vmatprep.subr.bf16.mxu1 %v2717_v22 }
 0x210   :  { %2348 = vmatpush3.bf16.msra.mxu1 %v2658_v13 }
 0x211   :  { %2349 = vmatprep.subr.bf16.mxu1 %v2717_v22 }
 0x214   :  { %2350 = vmatpush3.bf16.msra.mxu1 %v2659_v47 }
 0x215   :  { %2351 = vmatprep.subr.bf16.mxu1 %v2717_v22 }
 0x218   :  { %2352 = vmatpush3.bf16.msra.mxu1 %v2660_v35 }
 0x219   :  { %2353 = vmatprep.subr.bf16.mxu1 %v2717_v22 }
 0x21c   :  { %2354 = vmatpush3.bf16.msra.mxu1 %v2661_v36 }
 0x21d   :  { %2355 = vmatprep.subr.bf16.mxu1 %v2717_v22 }
 0x220   :  { %2356 = vmatpush3.bf16.msra.mxu1 %v2662_v37 }
 0x223   :  { %2358 = vmatmul.mubr.bf16.vlgmr.msra.gmra.mrb[20].mxu1 %v1725_v39 }
 0x2d6   :  { %v2326_v40 = vpop.f32.mrb[16].mxu1 }
 0x2d7   :  { %v2327_v41 = vpop.f32.mrb[17].mxu1 }
 0x2d8   :  { %v2328_v42 = vadd.f32 %v2327_v41, %v2326_v40  ;;  %v2329_v43 = vpop.f32.mrb[18].mxu1 }
 0x2d9   :  { %v2330_v44 = vpop.f32.mrb[19].mxu1 }
 0x2da   :  { %v1954_v46 = vadd.f32 %v2328_v42, %v1774_v45 }
 0x2f6   :  { %v1993_v48 = vpop.f32.mrb[20].mxu1 }
 0x2f7   :  { %v1994_v49 = vadd.f32 %v1993_v48, %v1954_v46  ;;  %v2359_v51 = vpop.f32.mrb[21].mxu1 }
 0x2f8   :  { %v1996_v52 = vpop.f32.mrb[22].mxu1 }
 0x2f9   :  { %1999 = vst [vmem:[%s2842_s5] sm:$0x1] %v1994_v49  ;;  %v2360_v53 = vpop.f32.mrb[23].mxu1 }
 0x2fa   :  { %2004 = vsyncpa [#allocation3], 1 }
 0x2fb   :  { %2005 = vsyncpa [#allocation5], 1 }

</bundles_post_ra>
